<compile_context>
chip_gen: v6e
topology: v6e:2x2x1
jax: 0.10.0
libtpu: 0.0.40
codegen_flags: <defaults>
</compile_context>

<pallas_src>
import functools

import jax
import jax.numpy as jnp
from jax.experimental import pallas as pl
from jax.experimental.pallas import tpu as pltpu

LEAKY_SLOPE = 0.2
BN_EPS = 1e-5
LANE = 128


def _round_up(n, m):
    return ((n + m - 1) // m) * m


# ----------------------------- Pallas kernels ------------------------------

def _conv_act_kernel(x_ref, w_ref, b_ref, o_ref, *, sigmoid):
    # y = X @ W + b, fused LeakyReLU (+ optional sigmoid).  No BN.
    # X/W are bf16, accumulation in f32 on the MXU.
    y = jnp.dot(x_ref[...], w_ref[...], preferred_element_type=jnp.float32)
    y = y + b_ref[...]
    y = jnp.where(y > 0, y, LEAKY_SLOPE * y)
    if sigmoid:
        y = jax.nn.sigmoid(y)
    o_ref[...] = y.astype(o_ref.dtype)


def _conv_bn_act_kernel(x_ref, w_ref, b_ref, g_ref, bt_ref, o_ref, *, sigmoid):
    # y = X @ W + b, training-mode BatchNorm over the M (=N*Ho*Wo) axis,
    # LeakyReLU(0.2), optional final sigmoid.  All fused in one kernel.
    # Exact batch statistics because the whole M axis is one block.
    y = jnp.dot(x_ref[...], w_ref[...], preferred_element_type=jnp.float32)
    y = y + b_ref[...]
    mean = jnp.mean(y, axis=0, keepdims=True)
    var = jnp.mean(jnp.square(y - mean), axis=0, keepdims=True)  # biased var
    y = (y - mean) * jax.lax.rsqrt(var + BN_EPS) * g_ref[...] + bt_ref[...]
    y = jnp.where(y > 0, y, LEAKY_SLOPE * y)
    if sigmoid:
        y = jax.nn.sigmoid(y)
    o_ref[...] = y.astype(o_ref.dtype)


# ----------------------------- kernel wrapper -------------------------------

def fused_conv_block(X, W, b, gamma=None, beta=None, *, sigmoid):
    """X: [M, K] bf16 (K = padded k*k*Cin), W: [K, C] bf16 (C multiple of 128).

    One grid step covers the full arrays: at these sizes everything fits VMEM
    comfortably and a single step avoids per-step overhead on single-TC chips.
    """
    M, K = X.shape
    C = W.shape[1]
    has_bn = gamma is not None

    n_vec = 3 if has_bn else 1
    cost = pl.CostEstimate(
        flops=2 * M * K * C,
        transcendentals=(M * C if sigmoid else 0) + (C if has_bn else 0),
        bytes_accessed=(M * K + K * C) * 2 + M * C * 4 + n_vec * C * 4,
    )

    vec_spec = pl.BlockSpec((1, C), lambda i: (0, 0))
    in_specs = [
        pl.BlockSpec((M, K), lambda i: (0, 0)),
        pl.BlockSpec((K, C), lambda i: (0, 0)),
        vec_spec,
    ]
    if has_bn:
        kernel = functools.partial(_conv_bn_act_kernel, sigmoid=sigmoid)
        in_specs += [vec_spec, vec_spec]
        args = (X, W, b, gamma, beta)
    else:
        kernel = functools.partial(_conv_act_kernel, sigmoid=sigmoid)
        args = (X, W, b)

    return pl.pallas_call(
        kernel,
        out_shape=jax.ShapeDtypeStruct((M, C), jnp.float32),
        grid=(1,),
        in_specs=in_specs,
        out_specs=pl.BlockSpec((M, C), lambda i: (0, 0)),
        compiler_params=pltpu.CompilerParams(
            dimension_semantics=("arbitrary",)),
        cost_estimate=cost,
    )(*args)


# ------------------------------- glue (JAX) ---------------------------------

def im2col_nhwc(x, k, s, p):
    # x: [N, H, W, C] with the REAL channel count -> X: [N*Ho*Wo, k*k*C],
    # column order (kh, kw, c), matching the weight row layout in prep_params.
    N, H, W, C = x.shape
    Ho = (H + 2 * p - k) // s + 1
    Wo = (W + 2 * p - k) // s + 1
    xp = jnp.pad(x, ((0, 0), (p, p), (p, p), (0, 0)))
    cols = []
    for i in range(k):
        for j in range(k):
            cols.append(xp[:, i:i + (Ho - 1) * s + 1:s,
                            j:j + (Wo - 1) * s + 1:s, :])
    X = jnp.concatenate(cols, axis=-1)                 # [N, Ho, Wo, k*k*C]
    return X.reshape(N * Ho * Wo, k * k * C), (N, Ho, Wo)


def init_params(key, config):
    feats = config['discriminator']['features']
    ks = config['discriminator']['kernel_size']
    params = []
    for i in range(len(feats) - 1):
        key, kw, kb = jax.random.split(key, 3)
        cin, cout, k = feats[i], feats[i + 1], ks[i]
        fan_in = cin * k * k
        bound = 1.0 / float(fan_in) ** 0.5   # torch Conv2d default init range
        w = jax.random.uniform(kw, (cout, cin, k, k), jnp.float32, -bound, bound)
        b = jax.random.uniform(kb, (cout,), jnp.float32, -bound, bound)
        p = {'w': w, 'b': b}
        if i != 0:
            p['gamma'] = jnp.ones((cout,), jnp.float32)
            p['beta'] = jnp.zeros((cout,), jnp.float32)
        params.append(p)
    return params


def prep_params(params):
    """One-time weight preprocessing (hoisted out of the forward pass).

    torch-layout weight [Cout, Cin, k, k] -> matmul weight [K_pad, Cout_pad]
    with dense row order (kh, kw, cin); K padded to a multiple of 16 (bf16
    sublane tile), Cout lane-padded to 128 for unmasked output stores.
    Zero pad rows/cols keep padded lanes exactly zero through the network.
    """
    prepped = []
    for p in params:
        w, b = p['w'], p['b']
        cout, cin, k, _ = w.shape
        K = k * k * cin
        K_pad = _round_up(K, 16)
        cout_p = _round_up(cout, LANE)
        w2d = w.transpose(2, 3, 1, 0).reshape(K, cout)      # rows (kh, kw, cin)
        w2d = jnp.pad(w2d, ((0, K_pad - K), (0, cout_p - cout)))
        entry = {
            'w2d': w2d.astype(jnp.bfloat16),
            'b2d': jnp.pad(b, (0, cout_p - cout)).reshape(1, cout_p)
                      .astype(jnp.float32),
        }
        if 'gamma' in p:
            entry['g2d'] = jnp.pad(p['gamma'], (0, cout_p - cout)).reshape(1, cout_p)
            entry['bt2d'] = jnp.pad(p['beta'], (0, cout_p - cout)).reshape(1, cout_p)
        prepped.append(entry)
    return prepped


def discriminator_forward(prepped, x, config):
    feats = config['discriminator']['features']
    ks = config['discriminator']['kernel_size']
    ss = config['discriminator']['stride']
    ps = config['discriminator']['padding']
    n_blocks = len(feats) - 1

    # NCHW -> NHWC once; keep the REAL channel count (no lane padding of Cin).
    x = x.transpose(0, 2, 3, 1)

    for i in range(n_blocks):
        k, s, pad = ks[i], ss[i], ps[i]
        cin, cout = feats[i], feats[i + 1]
        cout_p = _round_up(cout, LANE)
        is_last = i == n_blocks - 1
        layer = prepped[i]

        X, (N, Ho, Wo) = im2col_nhwc(x, k, s, pad)          # [M, k*k*cin] dense
        K = k * k * cin
        K_pad = layer['w2d'].shape[0]
        X = jnp.pad(X, ((0, 0), (0, K_pad - K))).astype(jnp.bfloat16)

        y = fused_conv_block(X, layer['w2d'], layer['b2d'],
                             layer.get('g2d'), layer.get('bt2d'),
                             sigmoid=is_last)

        # Kernel output is 128-lane wide (unmasked stores); slice back to the
        # real channel count so padding never re-enters the next layer's K.
        x = y.reshape(N, Ho, Wo, cout_p)[..., :cout]

    # back to NCHW at the module boundary.
    return x.transpose(0, 3, 1, 2)


# --------------------------------- main --------------------------------------

if __name__ == "__main__":
    config = {
        'discriminator': {
            'features': [4, 8, 16, 1],
            'kernel_size': [3, 3, 3],
            'stride': [2, 2, 1],
            'padding': [1, 1, 1],
        }
    }

    key = jax.random.PRNGKey(0)
    key, kx = jax.random.split(key)
    x = jax.random.normal(kx, (2, 4, 16, 16), jnp.float32)   # NCHW input

    params = init_params(key, config)
    prepped = prep_params(params)      # one-time weight prep, outside the jit

    fwd = jax.jit(lambda p, a: discriminator_forward(p, a, config))
    out = jax.block_until_ready(fwd(prepped, x))

    assert out.shape == (2, 1, 4, 4), out.shape
    assert bool(jnp.all((out >= 0.0) & (out <= 1.0)))
    assert bool(jnp.all(jnp.isfinite(out)))
    print("KERNEL_OK")
</pallas_src>

<mosaic_0001>
module attributes {stable_mosaic.version = 11 : i64} {
  func.func @_conv_act_kernel(%arg0: i32, %arg1: memref<128x48xbf16, #tpu.memory_space<vmem>>, %arg2: memref<48x128xbf16, #tpu.memory_space<vmem>>, %arg3: memref<1x128xf32, #tpu.memory_space<vmem>>, %arg4: memref<128x128xf32, #tpu.memory_space<vmem>>) attributes {dimension_semantics = [#tpu.dimension_semantics<arbitrary>], iteration_bounds = array<i64: 1>, scalar_prefetch = 0 : i64, scratch_operands = 0 : i64, tpu.core_type = #tpu.core_type<tc>, window_params = [{pipeline_mode = #tpu.pipeline_mode<synchronous>, transform_indices = @transform_0, window_bounds = array<i64: 128, 48>}, {pipeline_mode = #tpu.pipeline_mode<synchronous>, transform_indices = @transform_1, window_bounds = array<i64: 48, 128>}, {pipeline_mode = #tpu.pipeline_mode<synchronous>, transform_indices = @transform_2, window_bounds = array<i64: 1, 128>}, {pipeline_mode = #tpu.pipeline_mode<synchronous>, transform_indices = @transform_3, window_bounds = array<i64: 128, 128>}]} {
    %c0 = arith.constant 0 : index
    %c0_0 = arith.constant 0 : index
    %0 = vector.load %arg1[%c0, %c0_0] : memref<128x48xbf16, #tpu.memory_space<vmem>>, vector<128x48xbf16>
    %c0_1 = arith.constant 0 : index
    %c0_2 = arith.constant 0 : index
    %1 = vector.load %arg2[%c0_1, %c0_2] : memref<48x128xbf16, #tpu.memory_space<vmem>>, vector<48x128xbf16>
    %cst = arith.constant dense<0.000000e+00> : vector<128x128xf32>
    %2 = tpu.matmul %0, %1, %cst {dimension_numbers = #tpu.dot_dimension_numbers<[1], [0], [0], [1], [0, 0, 1, 1], [], []>} : vector<128x48xbf16>, vector<48x128xbf16>, vector<128x128xf32> -> vector<128x128xf32>
    %c0_3 = arith.constant 0 : index
    %c0_4 = arith.constant 0 : index
    %3 = vector.load %arg3[%c0_3, %c0_4] : memref<1x128xf32, #tpu.memory_space<vmem>>, vector<1x128xf32>
    %4 = vector.broadcast %3 : vector<1x128xf32> to vector<128x128xf32>
    %5 = arith.addf %2, %4 : vector<128x128xf32>
    %cst_5 = arith.constant 0.000000e+00 : f32
    %6 = vector.broadcast %cst_5 : f32 to vector<128x128xf32>
    %7 = arith.cmpf ogt, %5, %6 : vector<128x128xf32>
    %cst_6 = arith.constant 2.000000e-01 : f32
    %8 = vector.broadcast %cst_6 : f32 to vector<128x128xf32>
    %9 = arith.mulf %8, %5 : vector<128x128xf32>
    %10 = arith.select %7, %5, %9 : vector<128x128xi1>, vector<128x128xf32>
    %c0_7 = arith.constant 0 : index
    %c0_8 = arith.constant 0 : index
    %11 = vector.load %arg4[%c0_7, %c0_8] : memref<128x128xf32, #tpu.memory_space<vmem>>, vector<128x128xf32>
    tpu.vector_store %arg4[%c0_7, %c0_8], %10 {strides = array<i32>} : memref<128x128xf32, #tpu.memory_space<vmem>>, vector<128x128xf32>,
    return
  }
  func.func @transform_0(%arg0: i32) -> (i32, i32) {
    %c0_i32 = arith.constant 0 : i32
    %c0_i32_0 = arith.constant 0 : i32
    %c0_i32_1 = arith.constant 0 : i32
    return %c0_i32, %c0_i32_0 : i32, i32
  }
  func.func @transform_1(%arg0: i32) -> (i32, i32) {
    %c0_i32 = arith.constant 0 : i32
    %c0_i32_0 = arith.constant 0 : i32
    %c0_i32_1 = arith.constant 0 : i32
    return %c0_i32, %c0_i32_0 : i32, i32
  }
  func.func @transform_2(%arg0: i32) -> (i32, i32) {
    %c0_i32 = arith.constant 0 : i32
    %c0_i32_0 = arith.constant 0 : i32
    %c0_i32_1 = arith.constant 0 : i32
    return %c0_i32, %c0_i32_0 : i32, i32
  }
  func.func @transform_3(%arg0: i32) -> (i32, i32) {
    %c0_i32 = arith.constant 0 : i32
    %c0_i32_0 = arith.constant 0 : i32
    %c0_i32_1 = arith.constant 0 : i32
    return %c0_i32, %c0_i32_0 : i32, i32
  }
}

module attributes {stable_mosaic.version = 11 : i64} {
  func.func @_conv_bn_act_kernel(%arg0: i32, %arg1: memref<32x80xbf16, #tpu.memory_space<vmem>>, %arg2: memref<80x128xbf16, #tpu.memory_space<vmem>>, %arg3: memref<1x128xf32, #tpu.memory_space<vmem>>, %arg4: memref<1x128xf32, #tpu.memory_space<vmem>>, %arg5: memref<1x128xf32, #tpu.memory_space<vmem>>, %arg6: memref<32x128xf32, #tpu.memory_space<vmem>>) attributes {dimension_semantics = [#tpu.dimension_semantics<arbitrary>], iteration_bounds = array<i64: 1>, scalar_prefetch = 0 : i64, scratch_operands = 0 : i64, tpu.core_type = #tpu.core_type<tc>, window_params = [{pipeline_mode = #tpu.pipeline_mode<synchronous>, transform_indices = @transform_0, window_bounds = array<i64: 32, 80>}, {pipeline_mode = #tpu.pipeline_mode<synchronous>, transform_indices = @transform_1, window_bounds = array<i64: 80, 128>}, {pipeline_mode = #tpu.pipeline_mode<synchronous>, transform_indices = @transform_2, window_bounds = array<i64: 1, 128>}, {pipeline_mode = #tpu.pipeline_mode<synchronous>, transform_indices = @transform_3, window_bounds = array<i64: 1, 128>}, {pipeline_mode = #tpu.pipeline_mode<synchronous>, transform_indices = @transform_4, window_bounds = array<i64: 1, 128>}, {pipeline_mode = #tpu.pipeline_mode<synchronous>, transform_indices = @transform_5, window_bounds = array<i64: 32, 128>}]} {
    %c0 = arith.constant 0 : index
    %c0_0 = arith.constant 0 : index
    %0 = vector.load %arg1[%c0, %c0_0] : memref<32x80xbf16, #tpu.memory_space<vmem>>, vector<32x80xbf16>
    %c0_1 = arith.constant 0 : index
    %c0_2 = arith.constant 0 : index
    %1 = vector.load %arg2[%c0_1, %c0_2] : memref<80x128xbf16, #tpu.memory_space<vmem>>, vector<80x128xbf16>
    %cst = arith.constant dense<0.000000e+00> : vector<32x128xf32>
    %2 = tpu.matmul %0, %1, %cst {dimension_numbers = #tpu.dot_dimension_numbers<[1], [0], [0], [1], [0, 0, 1, 1], [], []>} : vector<32x80xbf16>, vector<80x128xbf16>, vector<32x128xf32> -> vector<32x128xf32>
    %c0_3 = arith.constant 0 : index
    %c0_4 = arith.constant 0 : index
    %3 = vector.load %arg3[%c0_3, %c0_4] : memref<1x128xf32, #tpu.memory_space<vmem>>, vector<1x128xf32>
    %4 = vector.broadcast %3 : vector<1x128xf32> to vector<32x128xf32>
    %5 = arith.addf %2, %4 : vector<32x128xf32>
    %cst_5 = arith.constant dense<0.000000e+00> : vector<128xf32>
    %6 = vector.multi_reduction <add>, %5, %cst_5 [0] : vector<32x128xf32> to vector<128xf32>
    %7 = vector.shape_cast %6 : vector<128xf32> to vector<1x128xf32>
    %cst_6 = arith.constant 3.200000e+01 : f32
    %8 = vector.broadcast %cst_6 : f32 to vector<1x128xf32>
    %9 = arith.divf %7, %8 : vector<1x128xf32>
    %10 = vector.broadcast %9 : vector<1x128xf32> to vector<32x128xf32>
    %11 = arith.subf %5, %10 : vector<32x128xf32>
    %12 = arith.mulf %11, %11 : vector<32x128xf32>
    %cst_7 = arith.constant dense<0.000000e+00> : vector<128xf32>
    %13 = vector.multi_reduction <add>, %12, %cst_7 [0] : vector<32x128xf32> to vector<128xf32>
    %14 = vector.shape_cast %13 : vector<128xf32> to vector<1x128xf32>
    %cst_8 = arith.constant 3.200000e+01 : f32
    %15 = vector.broadcast %cst_8 : f32 to vector<1x128xf32>
    %16 = arith.divf %14, %15 : vector<1x128xf32>
    %17 = vector.broadcast %9 : vector<1x128xf32> to vector<32x128xf32>
    %18 = arith.subf %5, %17 : vector<32x128xf32>
    %cst_9 = arith.constant 9.99999974E-6 : f32
    %19 = vector.broadcast %cst_9 : f32 to vector<1x128xf32>
    %20 = arith.addf %16, %19 : vector<1x128xf32>
    %21 = math.rsqrt %20 : vector<1x128xf32>
    %22 = vector.broadcast %21 : vector<1x128xf32> to vector<32x128xf32>
    %23 = arith.mulf %18, %22 : vector<32x128xf32>
    %c0_10 = arith.constant 0 : index
    %c0_11 = arith.constant 0 : index
    %24 = vector.load %arg4[%c0_10, %c0_11] : memref<1x128xf32, #tpu.memory_space<vmem>>, vector<1x128xf32>
    %25 = vector.broadcast %24 : vector<1x128xf32> to vector<32x128xf32>
    %26 = arith.mulf %23, %25 : vector<32x128xf32>
    %c0_12 = arith.constant 0 : index
    %c0_13 = arith.constant 0 : index
    %27 = vector.load %arg5[%c0_12, %c0_13] : memref<1x128xf32, #tpu.memory_space<vmem>>, vector<1x128xf32>
    %28 = vector.broadcast %27 : vector<1x128xf32> to vector<32x128xf32>
    %29 = arith.addf %26, %28 : vector<32x128xf32>
    %cst_14 = arith.constant 0.000000e+00 : f32
    %30 = vector.broadcast %cst_14 : f32 to vector<32x128xf32>
    %31 = arith.cmpf ogt, %29, %30 : vector<32x128xf32>
    %cst_15 = arith.constant 2.000000e-01 : f32
    %32 = vector.broadcast %cst_15 : f32 to vector<32x128xf32>
    %33 = arith.mulf %32, %29 : vector<32x128xf32>
    %34 = arith.select %31, %29, %33 : vector<32x128xi1>, vector<32x128xf32>
    %c0_16 = arith.constant 0 : index
    %c0_17 = arith.constant 0 : index
    %35 = vector.load %arg6[%c0_16, %c0_17] : memref<32x128xf32, #tpu.memory_space<vmem>>, vector<32x128xf32>
    tpu.vector_store %arg6[%c0_16, %c0_17], %34 {strides = array<i32>} : memref<32x128xf32, #tpu.memory_space<vmem>>, vector<32x128xf32>,
    return
  }
  func.func @transform_0(%arg0: i32) -> (i32, i32) {
    %c0_i32 = arith.constant 0 : i32
    %c0_i32_0 = arith.constant 0 : i32
    %c0_i32_1 = arith.constant 0 : i32
    return %c0_i32, %c0_i32_0 : i32, i32
  }
  func.func @transform_1(%arg0: i32) -> (i32, i32) {
    %c0_i32 = arith.constant 0 : i32
    %c0_i32_0 = arith.constant 0 : i32
    %c0_i32_1 = arith.constant 0 : i32
    return %c0_i32, %c0_i32_0 : i32, i32
  }
  func.func @transform_2(%arg0: i32) -> (i32, i32) {
    %c0_i32 = arith.constant 0 : i32
    %c0_i32_0 = arith.constant 0 : i32
    %c0_i32_1 = arith.constant 0 : i32
    return %c0_i32, %c0_i32_0 : i32, i32
  }
  func.func @transform_3(%arg0: i32) -> (i32, i32) {
    %c0_i32 = arith.constant 0 : i32
    %c0_i32_0 = arith.constant 0 : i32
    %c0_i32_1 = arith.constant 0 : i32
    return %c0_i32, %c0_i32_0 : i32, i32
  }
  func.func @transform_4(%arg0: i32) -> (i32, i32) {
    %c0_i32 = arith.constant 0 : i32
    %c0_i32_0 = arith.constant 0 : i32
    %c0_i32_1 = arith.constant 0 : i32
    return %c0_i32, %c0_i32_0 : i32, i32
  }
  func.func @transform_5(%arg0: i32) -> (i32, i32) {
    %c0_i32 = arith.constant 0 : i32
    %c0_i32_0 = arith.constant 0 : i32
    %c0_i32_1 = arith.constant 0 : i32
    return %c0_i32, %c0_i32_0 : i32, i32
  }
}

module attributes {stable_mosaic.version = 11 : i64} {
  func.func @_conv_bn_act_kernel(%arg0: i32, %arg1: memref<32x144xbf16, #tpu.memory_space<vmem>>, %arg2: memref<144x128xbf16, #tpu.memory_space<vmem>>, %arg3: memref<1x128xf32, #tpu.memory_space<vmem>>, %arg4: memref<1x128xf32, #tpu.memory_space<vmem>>, %arg5: memref<1x128xf32, #tpu.memory_space<vmem>>, %arg6: memref<32x128xf32, #tpu.memory_space<vmem>>) attributes {dimension_semantics = [#tpu.dimension_semantics<arbitrary>], iteration_bounds = array<i64: 1>, scalar_prefetch = 0 : i64, scratch_operands = 0 : i64, tpu.core_type = #tpu.core_type<tc>, window_params = [{pipeline_mode = #tpu.pipeline_mode<synchronous>, transform_indices = @transform_0, window_bounds = array<i64: 32, 144>}, {pipeline_mode = #tpu.pipeline_mode<synchronous>, transform_indices = @transform_1, window_bounds = array<i64: 144, 128>}, {pipeline_mode = #tpu.pipeline_mode<synchronous>, transform_indices = @transform_2, window_bounds = array<i64: 1, 128>}, {pipeline_mode = #tpu.pipeline_mode<synchronous>, transform_indices = @transform_3, window_bounds = array<i64: 1, 128>}, {pipeline_mode = #tpu.pipeline_mode<synchronous>, transform_indices = @transform_4, window_bounds = array<i64: 1, 128>}, {pipeline_mode = #tpu.pipeline_mode<synchronous>, transform_indices = @transform_5, window_bounds = array<i64: 32, 128>}]} {
    %c0 = arith.constant 0 : index
    %c0_0 = arith.constant 0 : index
    %0 = vector.load %arg1[%c0, %c0_0] : memref<32x144xbf16, #tpu.memory_space<vmem>>, vector<32x144xbf16>
    %c0_1 = arith.constant 0 : index
    %c0_2 = arith.constant 0 : index
    %1 = vector.load %arg2[%c0_1, %c0_2] : memref<144x128xbf16, #tpu.memory_space<vmem>>, vector<144x128xbf16>
    %cst = arith.constant dense<0.000000e+00> : vector<32x128xf32>
    %2 = tpu.matmul %0, %1, %cst {dimension_numbers = #tpu.dot_dimension_numbers<[1], [0], [0], [1], [0, 0, 1, 1], [], []>} : vector<32x144xbf16>, vector<144x128xbf16>, vector<32x128xf32> -> vector<32x128xf32>
    %c0_3 = arith.constant 0 : index
    %c0_4 = arith.constant 0 : index
    %3 = vector.load %arg3[%c0_3, %c0_4] : memref<1x128xf32, #tpu.memory_space<vmem>>, vector<1x128xf32>
    %4 = vector.broadcast %3 : vector<1x128xf32> to vector<32x128xf32>
    %5 = arith.addf %2, %4 : vector<32x128xf32>
    %cst_5 = arith.constant dense<0.000000e+00> : vector<128xf32>
    %6 = vector.multi_reduction <add>, %5, %cst_5 [0] : vector<32x128xf32> to vector<128xf32>
    %7 = vector.shape_cast %6 : vector<128xf32> to vector<1x128xf32>
    %cst_6 = arith.constant 3.200000e+01 : f32
    %8 = vector.broadcast %cst_6 : f32 to vector<1x128xf32>
    %9 = arith.divf %7, %8 : vector<1x128xf32>
    %10 = vector.broadcast %9 : vector<1x128xf32> to vector<32x128xf32>
    %11 = arith.subf %5, %10 : vector<32x128xf32>
    %12 = arith.mulf %11, %11 : vector<32x128xf32>
    %cst_7 = arith.constant dense<0.000000e+00> : vector<128xf32>
    %13 = vector.multi_reduction <add>, %12, %cst_7 [0] : vector<32x128xf32> to vector<128xf32>
    %14 = vector.shape_cast %13 : vector<128xf32> to vector<1x128xf32>
    %cst_8 = arith.constant 3.200000e+01 : f32
    %15 = vector.broadcast %cst_8 : f32 to vector<1x128xf32>
    %16 = arith.divf %14, %15 : vector<1x128xf32>
    %17 = vector.broadcast %9 : vector<1x128xf32> to vector<32x128xf32>
    %18 = arith.subf %5, %17 : vector<32x128xf32>
    %cst_9 = arith.constant 9.99999974E-6 : f32
    %19 = vector.broadcast %cst_9 : f32 to vector<1x128xf32>
    %20 = arith.addf %16, %19 : vector<1x128xf32>
    %21 = math.rsqrt %20 : vector<1x128xf32>
    %22 = vector.broadcast %21 : vector<1x128xf32> to vector<32x128xf32>
    %23 = arith.mulf %18, %22 : vector<32x128xf32>
    %c0_10 = arith.constant 0 : index
    %c0_11 = arith.constant 0 : index
    %24 = vector.load %arg4[%c0_10, %c0_11] : memref<1x128xf32, #tpu.memory_space<vmem>>, vector<1x128xf32>
    %25 = vector.broadcast %24 : vector<1x128xf32> to vector<32x128xf32>
    %26 = arith.mulf %23, %25 : vector<32x128xf32>
    %c0_12 = arith.constant 0 : index
    %c0_13 = arith.constant 0 : index
    %27 = vector.load %arg5[%c0_12, %c0_13] : memref<1x128xf32, #tpu.memory_space<vmem>>, vector<1x128xf32>
    %28 = vector.broadcast %27 : vector<1x128xf32> to vector<32x128xf32>
    %29 = arith.addf %26, %28 : vector<32x128xf32>
    %cst_14 = arith.constant 0.000000e+00 : f32
    %30 = vector.broadcast %cst_14 : f32 to vector<32x128xf32>
    %31 = arith.cmpf ogt, %29, %30 : vector<32x128xf32>
    %cst_15 = arith.constant 2.000000e-01 : f32
    %32 = vector.broadcast %cst_15 : f32 to vector<32x128xf32>
    %33 = arith.mulf %32, %29 : vector<32x128xf32>
    %34 = arith.select %31, %29, %33 : vector<32x128xi1>, vector<32x128xf32>
    %35 = arith.negf %34 : vector<32x128xf32>
    %36 = math.exp %35 : vector<32x128xf32>
    %cst_16 = arith.constant 1.000000e+00 : f32
    %37 = vector.broadcast %cst_16 : f32 to vector<32x128xf32>
    %38 = arith.addf %37, %36 : vector<32x128xf32>
    %39 = arith.divf %37, %38 : vector<32x128xf32>
    %c0_17 = arith.constant 0 : index
    %c0_18 = arith.constant 0 : index
    %40 = vector.load %arg6[%c0_17, %c0_18] : memref<32x128xf32, #tpu.memory_space<vmem>>, vector<32x128xf32>
    tpu.vector_store %arg6[%c0_17, %c0_18], %39 {strides = array<i32>} : memref<32x128xf32, #tpu.memory_space<vmem>>, vector<32x128xf32>,
    return
  }
  func.func @transform_0(%arg0: i32) -> (i32, i32) {
    %c0_i32 = arith.constant 0 : i32
    %c0_i32_0 = arith.constant 0 : i32
    %c0_i32_1 = arith.constant 0 : i32
    return %c0_i32, %c0_i32_0 : i32, i32
  }
  func.func @transform_1(%arg0: i32) -> (i32, i32) {
    %c0_i32 = arith.constant 0 : i32
    %c0_i32_0 = arith.constant 0 : i32
    %c0_i32_1 = arith.constant 0 : i32
    return %c0_i32, %c0_i32_0 : i32, i32
  }
  func.func @transform_2(%arg0: i32) -> (i32, i32) {
    %c0_i32 = arith.constant 0 : i32
    %c0_i32_0 = arith.constant 0 : i32
    %c0_i32_1 = arith.constant 0 : i32
    return %c0_i32, %c0_i32_0 : i32, i32
  }
  func.func @transform_3(%arg0: i32) -> (i32, i32) {
    %c0_i32 = arith.constant 0 : i32
    %c0_i32_0 = arith.constant 0 : i32
    %c0_i32_1 = arith.constant 0 : i32
    return %c0_i32, %c0_i32_0 : i32, i32
  }
  func.func @transform_4(%arg0: i32) -> (i32, i32) {
    %c0_i32 = arith.constant 0 : i32
    %c0_i32_0 = arith.constant 0 : i32
    %c0_i32_1 = arith.constant 0 : i32
    return %c0_i32, %c0_i32_0 : i32, i32
  }
  func.func @transform_5(%arg0: i32) -> (i32, i32) {
    %c0_i32 = arith.constant 0 : i32
    %c0_i32_0 = arith.constant 0 : i32
    %c0_i32_1 = arith.constant 0 : i32
    return %c0_i32, %c0_i32_0 : i32, i32
  }
}

</mosaic_0001>

<bundles_post_ra>
// kernel: _lambda_.3
= control target key start
LH: loop header
LB: loop body
LE: loop exit
PB: predicated region body
PF: predicated region fallthrough
CT: control target
= control target key end

     0   :  { %vm102_vm0 = vcmask 392192   ;;  %s492_s1 = inlined_call_operand.vmem [shape: bf16[48,128], index: 1, kind: input, shape index: {}]   ;;  %s493_s0 = inlined_call_operand.vmem [shape: bf16[128,48], index: 0, kind: input, shape index: {}]   ;;  %s494_s2 = inlined_call_operand.vmem [shape: f32[1,128], index: 2, kind: input, shape index: {}]   ;;  %s495_s3 = inlined_call_operand.vmem [shape: f32[128,128], index: 3, kind: output, shape index: {}]  }
   0x1   :  { %v351_v0 = vld [vmem:[%s492_s1 + $0x10] sm:$0xff]   ;;  %v352_v1 = vld [vmem:[%s492_s1 + $0x8] sm:$0xff]   ;;  %v353_v2 = vld [vmem:[%s492_s1] sm:$0xff]  }
   0x2   :  { %323 = vmatprep.subr.bf16.mxu0 %v351_v0  ;;  %345 = vmatprep.subr.bf16.mxu1 %v351_v0  ;;  %v354_v3 = vld [vmem:[%s493_s0] sm:$0xff]   ;;  %v356_v5 = vld [vmem:[%s493_s0 + $0x8] sm:$0xff]   ;;  %v358_v7 = vld [vmem:[%s493_s0 + $0x10] sm:$0xff]  }
   0x3   :  { %324 = vmatpush3.bf16.msra.mxu0 %v351_v0  ;;  %348 = vmatpush3.bf16.msra.mxu1 %v351_v0  ;;  %v355_v4 = vld [vmem:[%s493_s0 + $0x20] sm:$0xff]   ;;  %v357_v6 = vld [vmem:[%s493_s0 + $0x28] sm:$0xff]   ;;  %v359_v8 = vld [vmem:[%s493_s0 + $0x30] sm:$0xff]  }
   0x4   :  { %325 = vmatprep.subr.bf16.mxu0 %v352_v1  ;;  %346 = vmatprep.subr.bf16.mxu1 %v352_v1  ;;  %v360_v9 = vld [vmem:[%s493_s0 + $0x18] sm:$0xff]   ;;  %v426_v11 = vld [vmem:[%s494_s2] ss:$0 sm:$0xff] }
   0x5   :  { %329 = vmatprep.mubr.msk.bf16.mxu0 %vm102_vm0, %v354_v3  ;;  %337 = vmatprep.mubr.msk.bf16.mxu1 %vm102_vm0, %v355_v4  ;;  %v361_v10 = vld [vmem:[%s493_s0 + $0x38] sm:$0xff]  }
   0x7   :  { %326 = vmatpush3.bf16.msra.mxu0 %v352_v1  ;;  %349 = vmatpush3.bf16.msra.mxu1 %v352_v1 }
   0x8   :  { %327 = vmatprep.subr.bf16.mxu0 %v353_v2  ;;  %347 = vmatprep.subr.bf16.mxu1 %v353_v2 }
   0xb   :  { %328 = vmatpush3.bf16.msra.mxu0 %v353_v2  ;;  %350 = vmatpush3.bf16.msra.mxu1 %v353_v2 }
   0xe   :  { %330 = vmatmul.mubr.msk.bf16.vlgmr.msra.gmra.mxu0 %vm102_vm0, %v356_v5  ;;  %338 = vmatmul.mubr.msk.bf16.vlgmr.msra.gmra.mxu1 %vm102_vm0, %v357_v6 }
   0xf   :  { %333 = vmatprep.mubr.msk.bf16.mxu0 %vm102_vm0, %v358_v7  ;;  %341 = vmatprep.mubr.msk.bf16.mxu1 %vm102_vm0, %v359_v8 }
  0x16   :  { %334 = vmatmul.mubr.msk.bf16.gmra.mxu0 %vm102_vm0, %v360_v9  ;;  %342 = vmatmul.mubr.msk.bf16.gmra.mxu1 %vm102_vm0, %v361_v10 }
  0xce   :  { %v331_v12 = vpop.f32.mrf.mxu0  ;;  %v339_v13 = vpop.f32.mrf.mxu1 }
  0xcf   :  { %v170_v14 = vadd.f32 %v331_v12, %v426_v11  ;;  %v202_v15 = vadd.f32 %v339_v13, %v426_v11 }
  0xd0   :  { %v161_v16 = vpop.f32.mrf.mxu0  ;;  %v193_v17 = vpop.f32.mrf.mxu1 }
  0xd1   :  { %vm226_vm1 = vcmp.gt.f32.partialorder %v170_v14, 0.0  ;;  %v242_v18 = vmul.f32 0.2, %v170_v14  ;;  %vm234_vm2 = vcmp.gt.f32.partialorder %v202_v15, 0.0  ;;  %v250_v19 = vmul.f32 0.2, %v202_v15 }
  0xd2   :  { %v162_v20 = vadd.f32 %v426_v11, %v161_v16  ;;  %v194_v21 = vadd.f32 %v426_v11, %v193_v17  ;;  %v332_v22 = vpop.f32.mrf.mxu0  ;;  %v340_v23 = vpop.f32.mrf.mxu1 }
  0xd3   :  { %v258_v24 = vsel %vm226_vm1, %v170_v14, %v242_v18  ;;  %v266_v25 = vsel %vm234_vm2, %v202_v15, %v250_v19  ;;  %v173_v26 = vadd.f32 %v332_v22, %v426_v11  ;;  %v205_v27 = vadd.f32 %v340_v23, %v426_v11 }
  0xd4   :  { %274 = vst [vmem:[%s495_s3 + $0x10] sm:$0xff] %v258_v24  ;;  %282 = vst [vmem:[%s495_s3 + $0x50] sm:$0xff] %v266_v25  ;;  %vm224_vm3 = vcmp.gt.f32.partialorder %v162_v20, 0.0  ;;  %v240_v28 = vmul.f32 0.2, %v162_v20  ;;  %vm232_vm4 = vcmp.gt.f32.partialorder %v194_v21, 0.0  ;;  %v164_v30 = vpop.f32.mrf.mxu0  ;;  %v196_v31 = vpop.f32.mrf.mxu1 }
  0xd5   :  { %v248_v29 = vmul.f32 0.2, %v194_v21  ;;  %vm227_vm5 = vcmp.gt.f32.partialorder %v173_v26, 0.0  ;;  %v243_v32 = vmul.f32 0.2, %v173_v26  ;;  %vm235_vm6 = vcmp.gt.f32.partialorder %v205_v27, 0.0 }
  0xd6   :  { %v251_v33 = vmul.f32 0.2, %v205_v27  ;;  %v256_v34 = vsel %vm224_vm3, %v162_v20, %v240_v28  ;;  %v165_v36 = vadd.f32 %v426_v11, %v164_v30  ;;  %v197_v37 = vadd.f32 %v426_v11, %v196_v31  ;;  %v335_v38 = vpop.f32.mrf.mxu0  ;;  %v343_v39 = vpop.f32.mrf.mxu1 }
  0xd7   :  { %v264_v35 = vsel %vm232_vm4, %v194_v21, %v248_v29  ;;  %272 = vst [vmem:[%s495_s3] sm:$0xff] %v256_v34  ;;  %v259_v40 = vsel %vm227_vm5, %v173_v26, %v243_v32  ;;  %v186_v42 = vadd.f32 %v335_v38, %v426_v11  ;;  %v218_v43 = vadd.f32 %v343_v39, %v426_v11 }
  0xd8   :  { %280 = vst [vmem:[%s495_s3 + $0x40] sm:$0xff] %v264_v35  ;;  %v267_v41 = vsel %vm235_vm6, %v205_v27, %v251_v33  ;;  %275 = vst [vmem:[%s495_s3 + $0x18] sm:$0xff] %v259_v40  ;;  %vm225_vm7 = vcmp.gt.f32.partialorder %v165_v36, 0.0  ;;  %v241_v44 = vmul.f32 0.2, %v165_v36  ;;  %vm233_vm8 = vcmp.gt.f32.partialorder %v197_v37, 0.0  ;;  %v177_v46 = vpop.f32.mrf.mxu0  ;;  %v209_v47 = vpop.f32.mrf.mxu1 }
  0xd9   :  { %283 = vst [vmem:[%s495_s3 + $0x58] sm:$0xff] %v267_v41  ;;  %v249_v45 = vmul.f32 0.2, %v197_v37  ;;  %vm230_vm9 = vcmp.gt.f32.partialorder %v186_v42, 0.0  ;;  %v246_v48 = vmul.f32 0.2, %v186_v42  ;;  %v178_v52 = vadd.f32 %v426_v11, %v177_v46 }
  0xda   :  { %vm238_vm10 = vcmp.gt.f32.partialorder %v218_v43, 0.0  ;;  %v254_v49 = vmul.f32 0.2, %v218_v43  ;;  %v257_v50 = vsel %vm225_vm7, %v165_v36, %v241_v44  ;;  %v210_v53 = vadd.f32 %v426_v11, %v209_v47  ;;  %v336_v54 = vpop.f32.mrf.mxu0  ;;  %v344_v55 = vpop.f32.mrf.mxu1 }
  0xdb   :  { %v265_v51 = vsel %vm233_vm8, %v197_v37, %v249_v45  ;;  %273 = vst [vmem:[%s495_s3 + $0x8] sm:$0xff] %v257_v50  ;;  %v262_v56 = vsel %vm230_vm9, %v186_v42, %v246_v48  ;;  %v189_v58 = vadd.f32 %v336_v54, %v426_v11  ;;  %v221_v59 = vadd.f32 %v344_v55, %v426_v11 }
  0xdc   :  { %281 = vst [vmem:[%s495_s3 + $0x48] sm:$0xff] %v265_v51  ;;  %v270_v57 = vsel %vm238_vm10, %v218_v43, %v254_v49  ;;  %278 = vst [vmem:[%s495_s3 + $0x30] sm:$0xff] %v262_v56  ;;  %vm228_vm11 = vcmp.gt.f32.partialorder %v178_v52, 0.0  ;;  %v244_v60 = vmul.f32 0.2, %v178_v52  ;;  %vm236_vm12 = vcmp.gt.f32.partialorder %v210_v53, 0.0  ;;  %v180_v62 = vpop.f32.mrf.mxu0  ;;  %v212_v63 = vpop.f32.mrf.mxu1 }
  0xdd   :  { %286 = vst [vmem:[%s495_s3 + $0x70] sm:$0xff] %v270_v57  ;;  %v252_v61 = vmul.f32 0.2, %v210_v53  ;;  %vm231_vm13 = vcmp.gt.f32.partialorder %v189_v58, 0.0  ;;  %v247_v0 = vmul.f32 0.2, %v189_v58  ;;  %v181_v4 = vadd.f32 %v426_v11, %v180_v62 }
  0xde   :  { %vm239_vm14 = vcmp.gt.f32.partialorder %v221_v59, 0.0  ;;  %v255_v1 = vmul.f32 0.2, %v221_v59  ;;  %v260_v2 = vsel %vm228_vm11, %v178_v52, %v244_v60  ;;  %v213_v5 = vadd.f32 %v426_v11, %v212_v63 }
  0xdf   :  { %v268_v3 = vsel %vm236_vm12, %v210_v53, %v252_v61  ;;  %276 = vst [vmem:[%s495_s3 + $0x20] sm:$0xff] %v260_v2  ;;  %v263_v6 = vsel %vm231_vm13, %v189_v58, %v247_v0  ;;  %vm229_vm15 = vcmp.gt.f32.partialorder %v181_v4, 0.0  ;;  %v245_v8 = vmul.f32 0.2, %v181_v4 }
  0xe0   :  { %284 = vst [vmem:[%s495_s3 + $0x60] sm:$0xff] %v268_v3  ;;  %v271_v7 = vsel %vm239_vm14, %v221_v59, %v255_v1  ;;  %279 = vst [vmem:[%s495_s3 + $0x38] sm:$0xff] %v263_v6  ;;  %vm237_vm0 = vcmp.gt.f32.partialorder %v213_v5, 0.0  ;;  %v253_v9 = vmul.f32 0.2, %v213_v5 }
  0xe1   :  { %287 = vst [vmem:[%s495_s3 + $0x78] sm:$0xff] %v271_v7  ;;  %v261_v10 = vsel %vm229_vm15, %v181_v4, %v245_v8 }
  0xe2   :  { %v269_v11 = vsel %vm237_vm0, %v213_v5, %v253_v9  ;;  %277 = vst [vmem:[%s495_s3 + $0x28] sm:$0xff] %v261_v10 }
  0xe3   :  { %285 = vst [vmem:[%s495_s3 + $0x68] sm:$0xff] %v269_v11 }

// kernel: _lambda_.4
= control target key start
LH: loop header
LB: loop body
LE: loop exit
PB: predicated region body
PF: predicated region fallthrough
CT: control target
= control target key end

     0   :  { %vm82_vm0 = vcmask 654336   ;;  %s329_s1 = inlined_call_operand.vmem [shape: bf16[80,128], index: 1, kind: input, shape index: {}]   ;;  %s330_s0 = inlined_call_operand.vmem [shape: bf16[32,80], index: 0, kind: input, shape index: {}]   ;;  %s331_s2 = inlined_call_operand.vmem [shape: f32[1,128], index: 2, kind: input, shape index: {}]   ;;  %s332_s3 = inlined_call_operand.vmem [shape: f32[1,128], index: 3, kind: input, shape index: {}]   ;;  %s333_s4 = inlined_call_operand.vmem [shape: f32[1,128], index: 4, kind: input, shape index: {}]   ;;  %s334_s5 = inlined_call_operand.vmem [shape: f32[32,128], index: 5, kind: output, shape index: {}]  }
   0x1   :  { %v248_v0 = vld [vmem:[%s329_s1 + $0x20] sm:$0xff]   ;;  %v249_v1 = vld [vmem:[%s329_s1 + $0x18] sm:$0xff]   ;;  %v250_v2 = vld [vmem:[%s329_s1 + $0x10] sm:$0xff]  }
   0x2   :  { %234 = vmatprep.subr.bf16.mxu0 %v248_v0  ;;  %v253_v3 = vld [vmem:[%s330_s0] sm:$0xff]   ;;  %v251_v4 = vld [vmem:[%s329_s1 + $0x8] sm:$0xff]  }
   0x3   :  { %235 = vmatpush3.bf16.msra.mxu0 %v248_v0  ;;  %244 = vmatprep.mubr.msk.bf16.mxu0 %vm82_vm0, %v253_v3  ;;  %v252_v5 = vld [vmem:[%s329_s1] sm:$0xff]   ;;  %v254_v6 = vld [vmem:[%s330_s0 + $0x8] sm:$0xff]  }
   0x4   :  { %236 = vmatprep.subr.bf16.mxu0 %v249_v1  ;;  %v215_v10 = vld [vmem:[%s331_s2] ss:$0 sm:$0xff] }
   0x5   :  { %v225_v46 = vld [vmem:[%s332_s3] ss:$0 sm:$0xff] }
   0x6   :  { %v226_v51 = vld [vmem:[%s333_s4] ss:$0 sm:$0xff] }
   0x7   :  { %237 = vmatpush3.bf16.msra.mxu0 %v249_v1 }
   0x8   :  { %238 = vmatprep.subr.bf16.mxu0 %v250_v2 }
   0xb   :  { %239 = vmatpush3.bf16.msra.mxu0 %v250_v2 }
   0xc   :  { %240 = vmatprep.subr.bf16.mxu0 %v251_v4 }
   0xf   :  { %241 = vmatpush3.bf16.msra.mxu0 %v251_v4 }
  0x10   :  { %242 = vmatprep.subr.bf16.mxu0 %v252_v5 }
  0x13   :  { %243 = vmatpush3.bf16.msra.mxu0 %v252_v5 }
  0x16   :  { %245 = vmatmul.mubr.msk.bf16.vlgmr.msra.gmra.mxu0 %vm82_vm0, %v254_v6 }
  0xd6   :  { %v246_v7 = vpop.f32.mrf.mxu0 }
  0xd7   :  { %v132_v14 = vadd.f32 %v246_v7, %v215_v10 }
  0xd8   :  { %v123_v8 = vpop.f32.mrf.mxu0 }
  0xd9   :  { %v124_v12 = vadd.f32 %v215_v10, %v123_v8 }
  0xda   :  { %v247_v9 = vpop.f32.mrf.mxu0 }
  0xdb   :  { %v135_v16 = vadd.f32 %v247_v9, %v215_v10 }
  0xdc   :  { %v126_v11 = vpop.f32.mrf.mxu0 }
  0xdd   :  { %v127_v13 = vadd.f32 %v215_v10, %v126_v11 }
  0xdf   :  { %v138_v15 = vadd.f32 %v127_v13, %v124_v12 }
  0xe1   :  { %v139_v17 = vadd.f32 %v138_v15, %v132_v14 }
  0xe3   :  { %v140_v18 = vadd.f32 %v139_v17, %v135_v16 }
  0xe5   :  { %v141_v19 = vrot.slane %v140_v18, 4 }
  0xe7   :  { %v142_v20 = vadd.f32 %v141_v19, %v140_v18 }
  0xe9   :  { %v143_v21 = vrot.slane %v142_v20, 2 }
  0xeb   :  { %v144_v22 = vadd.f32 %v143_v21, %v142_v20 }
  0xed   :  { %v145_v23 = vrot.slane %v144_v22, 1 }
  0xef   :  { %v146_v24 = vadd.f32 %v145_v23, %v144_v22 }
  0xf1   :  { %v148_v25 = vmul.f32 0.03125, %v146_v24 }
  0xf3   :  { %v149_v26 = vsub.f32 %v124_v12, %v148_v25  ;;  %v150_v27 = vsub.f32 %v127_v13, %v148_v25  ;;  %v151_v28 = vsub.f32 %v132_v14, %v148_v25  ;;  %v152_v29 = vsub.f32 %v135_v16, %v148_v25 }
  0xf5   :  { %v153_v30 = vmul.f32 %v149_v26, %v149_v26  ;;  %v154_v31 = vmul.f32 %v150_v27, %v150_v27  ;;  %v155_v32 = vmul.f32 %v151_v28, %v151_v28  ;;  %v156_v34 = vmul.f32 %v152_v29, %v152_v29 }
  0xf7   :  { %v157_v33 = vadd.f32 %v154_v31, %v153_v30 }
  0xf9   :  { %v158_v35 = vadd.f32 %v157_v33, %v155_v32 }
  0xfb   :  { %v159_v36 = vadd.f32 %v158_v35, %v156_v34 }
  0xfd   :  { %v160_v37 = vrot.slane %v159_v36, 4 }
  0xff   :  { %v161_v38 = vadd.f32 %v160_v37, %v159_v36 }
 0x101   :  { %v162_v39 = vrot.slane %v161_v38, 2 }
 0x103   :  { %v163_v40 = vadd.f32 %v162_v39, %v161_v38 }
 0x105   :  { %v164_v41 = vrot.slane %v163_v40, 1 }
 0x107   :  { %v165_v42 = vadd.f32 %v164_v41, %v163_v40 }
 0x109   :  { %v166_v43 = vmul.f32 0.03125, %v165_v42 }
 0x10b   :  { %v167_v44 = vadd.f32 1e-05, %v166_v43 }
 0x10d   :  { %255 = vrsqrt.f32 %v167_v44 }
 0x11a   :  { %v256_v45 = vpop.eup %255 }
 0x11b   :  { %v169_v47 = vmul.f32 %v256_v45, %v149_v26  ;;  %v170_v48 = vmul.f32 %v256_v45, %v150_v27  ;;  %v171_v49 = vmul.f32 %v256_v45, %v151_v28  ;;  %v172_v50 = vmul.f32 %v256_v45, %v152_v29 }
 0x11d   :  { %v180_v52 = vmul.f32 %v225_v46, %v169_v47  ;;  %v181_v53 = vmul.f32 %v225_v46, %v170_v48  ;;  %v182_v54 = vmul.f32 %v225_v46, %v171_v49  ;;  %v183_v55 = vmul.f32 %v225_v46, %v172_v50 }
 0x11f   :  { %v191_v56 = vadd.f32 %v226_v51, %v180_v52  ;;  %v192_v57 = vadd.f32 %v226_v51, %v181_v53  ;;  %v193_v58 = vadd.f32 %v226_v51, %v182_v54  ;;  %v194_v59 = vadd.f32 %v226_v51, %v183_v55 }
 0x121   :  { %vm195_vm1 = vcmp.gt.f32.partialorder %v191_v56, 0.0  ;;  %vm196_vm2 = vcmp.gt.f32.partialorder %v192_v57, 0.0  ;;  %vm197_vm3 = vcmp.gt.f32.partialorder %v193_v58, 0.0  ;;  %vm198_vm4 = vcmp.gt.f32.partialorder %v194_v59, 0.0 }
 0x122   :  { %v199_v60 = vmul.f32 0.2, %v191_v56  ;;  %v200_v61 = vmul.f32 0.2, %v192_v57  ;;  %v201_v62 = vmul.f32 0.2, %v193_v58 }
 0x123   :  { %v202_v63 = vmul.f32 0.2, %v194_v59 }
 0x124   :  { %v203_v0 = vsel %vm195_vm1, %v191_v56, %v199_v60  ;;  %v204_v1 = vsel %vm196_vm2, %v192_v57, %v200_v61  ;;  %v205_v2 = vsel %vm197_vm3, %v193_v58, %v201_v62 }
 0x125   :  { %v206_v3 = vsel %vm198_vm4, %v194_v59, %v202_v63  ;;  %207 = vst [vmem:[%s334_s5] sm:$0xff] %v203_v0  ;;  %208 = vst [vmem:[%s334_s5 + $0x8] sm:$0xff] %v204_v1 }
 0x126   :  { %209 = vst [vmem:[%s334_s5 + $0x10] sm:$0xff] %v205_v2  ;;  %210 = vst [vmem:[%s334_s5 + $0x18] sm:$0xff] %v206_v3 }

// kernel: _lambda_.5
= control target key start
LH: loop header
LB: loop body
LE: loop exit
PB: predicated region body
PF: predicated region fallthrough
CT: control target
= control target key end

     0   :  { %v353_v0 = vmov 0   ;;  %vm122_vm0 = vcmask 130048   ;;  %s444_s1 = inlined_call_operand.vmem [shape: bf16[144,128], index: 1, kind: input, shape index: {}]   ;;  %s445_s0 = inlined_call_operand.vmem [shape: bf16[32,144], index: 0, kind: input, shape index: {}]   ;;  %s446_s2 = inlined_call_operand.vmem [shape: f32[1,128], index: 2, kind: input, shape index: {}]   ;;  %s447_s3 = inlined_call_operand.vmem [shape: f32[1,128], index: 3, kind: input, shape index: {}]   ;;  %s448_s4 = inlined_call_operand.vmem [shape: f32[1,128], index: 4, kind: input, shape index: {}]   ;;  %s449_s5 = inlined_call_operand.vmem [shape: f32[32,128], index: 5, kind: output, shape index: {}]  }
   0x1   :  { %129 = vmatprep.subr.bf16.mxu0 %v353_v0  ;;  %301 = vmatprep.subr.bf16.mxu1 %v353_v0  ;;  %v320_v1 = vld [vmem:[%s444_s1 + $0x38] sm:$0xff]   ;;  %v321_v2 = vld [vmem:[%s444_s1 + $0x30] sm:$0xff]   ;;  %v322_v3 = vld [vmem:[%s444_s1 + $0x28] sm:$0xff]  }
   0x2   :  { %130 = vmatpush1.bf16.msra.mxu0 %v320_v1  ;;  %310 = vmatpush1.bf16.msra.mxu1 %v320_v1  ;;  %v323_v4 = vld [vmem:[%s444_s1 + $0x20] sm:$0xff]   ;;  %v334_v6 = vld [vmem:[%s445_s0 + $0x14] ss:$8 sps:$4 sm:$0xff]   ;;  %v326_v9 = vld [vmem:[%s444_s1 + $0x8] sm:$0xff]  }
   0x3   :  { %131 = vmatprep.subr.bf16.mxu0 %v353_v0  ;;  %302 = vmatprep.subr.bf16.mxu1 %v353_v0  ;;  %v331_v5 = vld [vmem:[%s445_s0 + $0x4] ss:$8 sps:$4 sm:$0xff]   ;;  %v324_v7 = vld [vmem:[%s444_s1 + $0x18] sm:$0xff]   ;;  %v325_v8 = vld [vmem:[%s444_s1 + $0x10] sm:$0xff]  }
   0x4   :  { %293 = vmatprep.mubr.msk.bf16.mxu0 %vm122_vm0, %v331_v5  ;;  %294 = vmatprep.mubr.msk.bf16.mxu1 %vm122_vm0, %v334_v6  ;;  %v327_v10 = vld [vmem:[%s444_s1] sm:$0xff]   ;;  %v332_v13 = vld [vmem:[%s445_s0 + $0x10] ss:$8 sps:$4 sm:$0xff]  }
   0x5   :  { %v328_v11 = vld [vmem:[%s444_s1 + $0x40] sm:$0xff]  }
   0x6   :  { %132 = vmatpush1.bf16.msra.mxu0 %v321_v2  ;;  %311 = vmatpush1.bf16.msra.mxu1 %v321_v2  ;;  %v329_v12 = vld [vmem:[%s445_s0] ss:$8 sps:$4 sm:$0xff]  }
   0x7   :  { %133 = vmatprep.subr.bf16.mxu0 %v353_v0  ;;  %303 = vmatprep.subr.bf16.mxu1 %v353_v0  ;;  %v279_v16 = vld [vmem:[%s446_s2] ss:$0 sm:$0xff] }
   0x8   :  { %v295_v57 = vld [vmem:[%s447_s3] ss:$0 sm:$0xff] }
   0x9   :  { %v296_v62 = vld [vmem:[%s448_s4] ss:$0 sm:$0xff] }
   0xa   :  { %134 = vmatpush1.bf16.msra.mxu0 %v322_v3  ;;  %312 = vmatpush1.bf16.msra.mxu1 %v322_v3 }
   0xb   :  { %135 = vmatprep.subr.bf16.mxu0 %v353_v0  ;;  %304 = vmatprep.subr.bf16.mxu1 %v353_v0 }
   0xe   :  { %136 = vmatpush1.bf16.msra.mxu0 %v323_v4  ;;  %313 = vmatpush1.bf16.msra.mxu1 %v323_v4 }
   0xf   :  { %137 = vmatprep.subr.bf16.mxu0 %v353_v0  ;;  %305 = vmatprep.subr.bf16.mxu1 %v353_v0 }
  0x12   :  { %138 = vmatpush1.bf16.msra.mxu0 %v324_v7  ;;  %314 = vmatpush1.bf16.msra.mxu1 %v324_v7 }
  0x13   :  { %139 = vmatprep.subr.bf16.mxu0 %v353_v0  ;;  %306 = vmatprep.subr.bf16.mxu1 %v353_v0 }
  0x16   :  { %140 = vmatpush1.bf16.msra.mxu0 %v325_v8  ;;  %315 = vmatpush1.bf16.msra.mxu1 %v325_v8 }
  0x17   :  { %141 = vmatprep.subr.bf16.mxu0 %v353_v0  ;;  %307 = vmatprep.subr.bf16.mxu1 %v353_v0 }
  0x1a   :  { %142 = vmatpush1.bf16.msra.mxu0 %v326_v9  ;;  %316 = vmatpush1.bf16.msra.mxu1 %v326_v9 }
  0x1b   :  { %143 = vmatprep.subr.bf16.mxu0 %v353_v0  ;;  %308 = vmatprep.subr.bf16.mxu1 %v353_v0 }
  0x1e   :  { %144 = vmatpush1.bf16.msra.mxu0 %v327_v10  ;;  %317 = vmatpush1.bf16.msra.mxu1 %v327_v10 }
  0x1f   :  { %159 = vmatprep.subr.bf16.mxu0 %v353_v0  ;;  %309 = vmatprep.subr.bf16.mxu1 %v353_v0 }
  0x22   :  { %160 = vmatpush2.bf16.msra.mxu0 %v328_v11  ;;  %318 = vmatpush2.bf16.msra.mxu1 %v328_v11 }
  0x25   :  { %162 = vmatmul.mubr.bf16.vlgmr.msra.gmra.mxu0 %v329_v12  ;;  %170 = vmatmul.mubr.bf16.vlgmr.msra.gmra.mxu1 %v332_v13 }
  0xe5   :  { %v163_v14 = vpop.f32.mrf.mxu0  ;;  %v171_v15 = vpop.f32.mrf.mxu1 }
  0xe6   :  { %v164_v21 = vadd.f32 %v279_v16, %v163_v14  ;;  %v172_v25 = vadd.f32 %v279_v16, %v171_v15 }
  0xe7   :  { %v165_v17 = vpop.f32.mrf.mxu0  ;;  %v173_v18 = vpop.f32.mrf.mxu1 }
  0xe9   :  { %v166_v19 = vpop.f32.mrf.mxu0  ;;  %v174_v20 = vpop.f32.mrf.mxu1 }
  0xea   :  { %v167_v22 = vadd.f32 %v279_v16, %v166_v19  ;;  %v175_v27 = vadd.f32 %v279_v16, %v174_v20 }
  0xeb   :  { %v168_v23 = vpop.f32.mrf.mxu0  ;;  %v176_v24 = vpop.f32.mrf.mxu1 }
  0xec   :  { %v178_v26 = vadd.f32 %v167_v22, %v164_v21 }
  0xee   :  { %v179_v28 = vadd.f32 %v178_v26, %v172_v25 }
  0xf0   :  { %v180_v29 = vadd.f32 %v179_v28, %v175_v27 }
  0xf2   :  { %v181_v30 = vrot.slane %v180_v29, 4 }
  0xf4   :  { %v182_v31 = vadd.f32 %v181_v30, %v180_v29 }
  0xf6   :  { %v183_v32 = vrot.slane %v182_v31, 2 }
  0xf8   :  { %v184_v33 = vadd.f32 %v183_v32, %v182_v31 }
  0xfa   :  { %v185_v34 = vrot.slane %v184_v33, 1 }
  0xfc   :  { %v186_v35 = vadd.f32 %v185_v34, %v184_v33 }
  0xfe   :  { %v188_v36 = vmul.f32 0.03125, %v186_v35 }
 0x100   :  { %v189_v37 = vsub.f32 %v164_v21, %v188_v36  ;;  %v190_v38 = vsub.f32 %v167_v22, %v188_v36  ;;  %v191_v39 = vsub.f32 %v172_v25, %v188_v36  ;;  %v192_v40 = vsub.f32 %v175_v27, %v188_v36 }
 0x102   :  { %v193_v41 = vmul.f32 %v189_v37, %v189_v37  ;;  %v194_v42 = vmul.f32 %v190_v38, %v190_v38  ;;  %v195_v43 = vmul.f32 %v191_v39, %v191_v39  ;;  %v196_v45 = vmul.f32 %v192_v40, %v192_v40 }
 0x104   :  { %v197_v44 = vadd.f32 %v194_v42, %v193_v41 }
 0x106   :  { %v198_v46 = vadd.f32 %v197_v44, %v195_v43 }
 0x108   :  { %v199_v47 = vadd.f32 %v198_v46, %v196_v45 }
 0x10a   :  { %v200_v48 = vrot.slane %v199_v47, 4 }
 0x10c   :  { %v201_v49 = vadd.f32 %v200_v48, %v199_v47 }
 0x10e   :  { %v202_v50 = vrot.slane %v201_v49, 2 }
 0x110   :  { %v203_v51 = vadd.f32 %v202_v50, %v201_v49 }
 0x112   :  { %v204_v52 = vrot.slane %v203_v51, 1 }
 0x114   :  { %v205_v53 = vadd.f32 %v204_v52, %v203_v51 }
 0x116   :  { %v206_v54 = vmul.f32 0.03125, %v205_v53 }
 0x118   :  { %v207_v55 = vadd.f32 1e-05, %v206_v54 }
 0x11a   :  { %335 = vrsqrt.f32 %v207_v55 }
 0x127   :  { %v336_v56 = vpop.eup %335 }
 0x128   :  { %v209_v58 = vmul.f32 %v336_v56, %v189_v37  ;;  %v210_v59 = vmul.f32 %v336_v56, %v190_v38  ;;  %v211_v60 = vmul.f32 %v336_v56, %v191_v39  ;;  %v212_v61 = vmul.f32 %v336_v56, %v192_v40 }
 0x12a   :  { %v220_v63 = vmul.f32 %v295_v57, %v209_v58  ;;  %v221_v0 = vmul.f32 %v295_v57, %v210_v59  ;;  %v222_v1 = vmul.f32 %v295_v57, %v211_v60  ;;  %v223_v2 = vmul.f32 %v295_v57, %v212_v61 }
 0x12c   :  { %v231_v3 = vadd.f32 %v296_v62, %v220_v63  ;;  %v232_v4 = vadd.f32 %v296_v62, %v221_v0  ;;  %v233_v5 = vadd.f32 %v296_v62, %v222_v1  ;;  %v234_v6 = vadd.f32 %v296_v62, %v223_v2 }
 0x12e   :  { %vm235_vm1 = vcmp.gt.f32.partialorder %v231_v3, 0.0  ;;  %vm236_vm2 = vcmp.gt.f32.partialorder %v232_v4, 0.0  ;;  %vm237_vm3 = vcmp.gt.f32.partialorder %v233_v5, 0.0  ;;  %vm238_vm4 = vcmp.gt.f32.partialorder %v234_v6, 0.0 }
 0x12f   :  { %v239_v7 = vmul.f32 0.2, %v231_v3  ;;  %v240_v8 = vmul.f32 0.2, %v232_v4  ;;  %v241_v9 = vmul.f32 0.2, %v233_v5 }
 0x130   :  { %v242_v10 = vmul.f32 0.2, %v234_v6 }
 0x131   :  { %v243_v11 = vsel %vm235_vm1, %v231_v3, %v239_v7  ;;  %v244_v12 = vsel %vm236_vm2, %v232_v4, %v240_v8  ;;  %v245_v13 = vsel %vm237_vm3, %v233_v5, %v241_v9 }
 0x132   :  { %v246_v14 = vsel %vm238_vm4, %v234_v6, %v242_v10  ;;  %v297_v15 = vmul.f32 -1.442695, %v243_v11  ;;  %v298_v16 = vmul.f32 -1.442695, %v244_v12  ;;  %v299_v17 = vmul.f32 -1.442695, %v245_v13 }
 0x133   :  { %v300_v18 = vmul.f32 -1.442695, %v246_v14 }
 0x134   :  { %337 = vpow2.f32 %v297_v15 }
 0x135   :  { %339 = vpow2.f32 %v298_v16 }
 0x136   :  { %341 = vpow2.f32 %v299_v17 }
 0x137   :  { %343 = vpow2.f32 %v300_v18 }
 0x141   :  { %v338_v19 = vpop.eup %337 }
 0x142   :  { %v340_v20 = vpop.eup %339  ;;  %v259_v21 = vadd.f32 1.0, %v338_v19 }
 0x143   :  { %v342_v22 = vpop.eup %341  ;;  %v260_v23 = vadd.f32 1.0, %v340_v20 }
 0x144   :  { %v344_v24 = vpop.eup %343  ;;  %v261_v25 = vadd.f32 1.0, %v342_v22  ;;  %345 = vrcp.f32 %v259_v21 }
 0x145   :  { %v262_v26 = vadd.f32 1.0, %v344_v24  ;;  %347 = vrcp.f32 %v260_v23 }
 0x146   :  { %349 = vrcp.f32 %v261_v25 }
 0x147   :  { %351 = vrcp.f32 %v262_v26 }
 0x151   :  { %v346_v27 = vpop.eup %345 }
 0x152   :  { %v348_v28 = vpop.eup %347  ;;  %271 = vst [vmem:[%s449_s5] sm:$0xff] %v346_v27 }
 0x153   :  { %v350_v29 = vpop.eup %349  ;;  %272 = vst [vmem:[%s449_s5 + $0x8] sm:$0xff] %v348_v28 }
 0x154   :  { %v352_v30 = vpop.eup %351  ;;  %273 = vst [vmem:[%s449_s5 + $0x10] sm:$0xff] %v350_v29 }
 0x155   :  { %274 = vst [vmem:[%s449_s5 + $0x18] sm:$0xff] %v352_v30 }

</bundles_post_ra>
